<compile_context>
chip_gen: v7x
topology: tpu7x:2x2x1
jax: 0.10.0
libtpu: 0.0.40
codegen_flags: <defaults>
</compile_context>

<pallas_src>
import jax
import jax.numpy as jnp
from jax.experimental import pallas as pl
from jax.experimental.pallas import tpu as pltpu

CHUNK = 128  # lane-chunk size for the in-kernel loop (one vreg lane-width)


def _sto_envelope_kernel(w_ref, en_ref, pi_ref, x_ref, o_ref):
    # w_ref : [D*AO, D*A]  block-diagonal sigma (block i = sigma[i] as [AO, A])
    # en_ref: [AO, CHUNK]  exp(clamp(n,-10,5)), pre-broadcast over lanes
    # pi_ref: [AO, CHUNK]  pi, pre-broadcast over lanes
    # x_ref : [D*A, TM]    x[i*A + j, m] = ae[b, e, j, i], m = b*E + e
    # o_ref : [O, TM]      output tile (lane-dense stores)
    AO, CH = en_ref.shape
    O, TM = o_ref.shape
    A = AO // O
    D = x_ref.shape[0] // A
    n_chunks = TM // CH

    # Statically unrolled chunk loop: each iteration touches only an
    # [*, CHUNK]-wide slice, bounding the live vreg working set.
    for c in range(n_chunks):
        lo = c * CH
        xc = x_ref[:, lo:lo + CH]                                  # [D*A, CH]
        # Single MXU matmul per chunk (block-diagonal LHS fuses the D=3 dots).
        s = jnp.dot(w_ref[...], xc,
                    preferred_element_type=jnp.float32)            # [D*AO, CH]
        # Squared norm over the spatial dim: sum of squared AO-row blocks.
        acc = s[0:AO, :] * s[0:AO, :]
        for i in range(1, D):
            si = s[i * AO:(i + 1) * AO, :]
            acc = acc + si * si
        # clamp(r,1e-10,50) == sqrt(clamp(r^2,1e-20,2500)); log r = 0.5*log(r^2)
        acc_c = jnp.clip(acc, 1e-20, 2500.0)
        r_safe = jnp.sqrt(acc_c)
        log_r = 0.5 * jnp.log(acc_c)
        weighted = jnp.exp(en_ref[...] * log_r - r_safe) * pi_ref[...]  # [AO,CH]
        # Atom reduction: sum the A sublane blocks of O rows each (VPU adds).
        out = weighted[0:O, :]
        for k in range(1, A):
            out = out + weighted[k * O:(k + 1) * O, :]
        o_ref[:, lo:lo + CH] = out.astype(o_ref.dtype)


def sto_envelope_forward(ae, r_ae, r_ee, pi, sigma, n, *, tm_max=4096):
    """Pallas-backed STOEnvelope.forward. r_ae / r_ee are unused (as in the module)."""
    del r_ae, r_ee
    B, E, A, D = ae.shape
    O = sigma.shape[-1]
    assert sigma.shape == (D, D, A, O)
    assert A == D, "einsum in STOEnvelope.forward requires n_atoms == n_dim"

    # Pad output_dim to a multiple of 8 so sublane-block slices stay aligned.
    O_pad = ((O + 7) // 8) * 8
    if O_pad != O:
        sigma = jnp.pad(sigma, ((0, 0), (0, 0), (0, 0), (0, O_pad - O)))
        pi = jnp.pad(pi, ((0, 0), (0, O_pad - O)))
        n = jnp.pad(n, ((0, 0), (0, O_pad - O)))

    AO = A * O_pad
    M = B * E

    # Tile selection: multiple of CHUNK; cap at m_pad//2 (when possible) so the
    # grid has >= 2 steps for megacore sharding; cap at tm_max for VMEM.
    m_pad = ((M + CHUNK - 1) // CHUNK) * CHUNK
    if m_pad <= CHUNK:
        TM = CHUNK
    else:
        TM = max(CHUNK, min(tm_max, (m_pad // 2) // CHUNK * CHUNK))
    m_pad = ((M + TM - 1) // TM) * TM

    # TODO(synk): the x / output layout transposes below add wrapper-side HBM
    # traffic; fuse them into ae's producer / the consumer ([D*A, M] in,
    # [O, M] out) when integrating into a larger model.
    # x[i*A + j, m] = ae[b, e, j, i]  ->  [D*A, M]
    x = jnp.transpose(ae, (3, 2, 0, 1)).reshape(D * A, M).astype(jnp.float32)
    if m_pad != M:
        x = jnp.pad(x, ((0, 0), (0, m_pad - M)))

    # Block-diagonal sigma: w_bd[i*AO + (k*O_pad+l), i*A + j] = sigma[i, j, k, l]
    w = jnp.transpose(sigma, (0, 2, 3, 1)).reshape(D, AO, A).astype(jnp.float32)
    eye_d = jnp.eye(D, dtype=jnp.float32)
    w_bd = (w[:, :, None, :] * eye_d[:, None, :, None]).reshape(D * AO, D * A)

    # Hoist exp(clamp(n)) out of the kernel; pre-broadcast both scale vectors
    # to [AO, CHUNK] so no broadcast_in_dim is emitted inside the chunk loop.
    en_b = jnp.broadcast_to(
        jnp.exp(jnp.clip(n.astype(jnp.float32), -10.0, 5.0)).reshape(AO, 1),
        (AO, CHUNK))
    pi_b = jnp.broadcast_to(pi.astype(jnp.float32).reshape(AO, 1), (AO, CHUNK))

    grid = (m_pad // TM,)
    out_t = pl.pallas_call(
        _sto_envelope_kernel,
        out_shape=jax.ShapeDtypeStruct((O_pad, m_pad), jnp.float32),
        grid=grid,
        in_specs=[
            pl.BlockSpec((D * AO, D * A), lambda m: (0, 0)),  # block-diag sigma
            pl.BlockSpec((AO, CHUNK), lambda m: (0, 0)),      # exp(clip(n)), resident
            pl.BlockSpec((AO, CHUNK), lambda m: (0, 0)),      # pi, resident
            pl.BlockSpec((D * A, TM), lambda m: (0, m)),      # x tile over M
        ],
        out_specs=pl.BlockSpec((O_pad, TM), lambda m: (0, m)),
        compiler_params=pltpu.CompilerParams(
            dimension_semantics=("parallel",)),
    )(w_bd, en_b, pi_b, x)

    # Strip padding, transpose back to [M, O], reshape to [B, E, O].
    return jnp.transpose(out_t[:O, :M]).reshape(B, E, O)


def sto_envelope_ref(ae, pi, sigma, n):
    """Pure-JAX reference matching the PyTorch forward exactly."""
    ae_t = jnp.transpose(ae, (0, 1, 3, 2))
    ae_sigma = jnp.einsum('ijkl,mnij->mnikl', sigma, ae_t)
    r = jnp.linalg.norm(ae_sigma, axis=2)
    r_safe = jnp.clip(r, 1e-10, 50.0)
    exp_n = jnp.exp(jnp.clip(n, -10.0, 5.0))
    exp_r = jnp.exp(-r_safe + exp_n * jnp.log(r_safe))
    return jnp.sum(exp_r * pi, axis=2)


def _make_inputs(batch, n_electrons, n_atoms, n_dim, output_dim, key):
    k_ae, k_pi, k_sig, k_n = jax.random.split(key, 4)
    ae = jax.random.normal(k_ae, (batch, n_electrons, n_atoms, n_dim), jnp.float32)
    r_ae = jnp.linalg.norm(ae, axis=-1, keepdims=True)
    r_ee = jnp.ones((batch, n_electrons, n_electrons, 1), jnp.float32)
    pi = jnp.ones((n_atoms, output_dim), jnp.float32) \
        + 0.1 * jax.random.normal(k_pi, (n_atoms, output_dim), jnp.float32)
    sigma = jnp.broadcast_to(
        jnp.eye(n_dim, dtype=jnp.float32)[:, :, None, None],
        (n_dim, n_dim, n_atoms, output_dim)) \
        + 0.05 * jax.random.normal(k_sig, (n_dim, n_dim, n_atoms, output_dim), jnp.float32)
    n = -2.0 * jnp.ones((n_atoms, output_dim), jnp.float32) \
        + 0.1 * jax.random.normal(k_n, (n_atoms, output_dim), jnp.float32)
    return ae, r_ae, r_ee, pi, sigma, n


if __name__ == "__main__":
    key = jax.random.PRNGKey(0)
    k1, k2 = jax.random.split(key)

    # Test 1: tiny shapes (single grid step, single chunk), n_atoms == n_dim = 3.
    B1, E1, A1, D1, O1 = 2, 8, 3, 3, 32
    ae, r_ae, r_ee, pi, sigma, n = _make_inputs(B1, E1, A1, D1, O1, k1)
    out = jax.block_until_ready(sto_envelope_forward(ae, r_ae, r_ee, pi, sigma, n))
    ref = sto_envelope_ref(ae, pi, sigma, n)
    assert out.shape == (B1, E1, O1)
    assert jnp.allclose(out, ref, rtol=1e-5, atol=1e-5), "Pallas kernel mismatch (test 1)"

    # Test 2: exercises the multi-chunk inner loop, grid = 2 (megacore path),
    # M-padding, and the non-multiple-of-8 output_dim padding path.
    B2, E2, O2 = 2, 200, 20   # M = 400 -> TM = 256 (2 chunks), grid = 2; O_pad = 24
    ae2, r_ae2, r_ee2, pi2, sigma2, n2 = _make_inputs(B2, E2, A1, D1, O2, k2)
    out2 = jax.block_until_ready(sto_envelope_forward(ae2, r_ae2, r_ee2, pi2, sigma2, n2))
    ref2 = sto_envelope_ref(ae2, pi2, sigma2, n2)
    assert out2.shape == (B2, E2, O2)
    assert jnp.allclose(out2, ref2, rtol=1e-5, atol=1e-5), "Pallas kernel mismatch (test 2)"

    print("KERNEL_OK")
</pallas_src>

<mosaic_0001>
module attributes {stable_mosaic.version = 11 : i64} {
  func.func @_sto_envelope_kernel(%arg0: i32, %arg1: memref<288x9xf32, #tpu.memory_space<vmem>>, %arg2: memref<96x128xf32, #tpu.memory_space<vmem>>, %arg3: memref<96x128xf32, #tpu.memory_space<vmem>>, %arg4: memref<9x128xf32, #tpu.memory_space<vmem>>, %arg5: memref<32x128xf32, #tpu.memory_space<vmem>>) attributes {dimension_semantics = [#tpu.dimension_semantics<parallel>], iteration_bounds = array<i64: 1>, scalar_prefetch = 0 : i64, scratch_operands = 0 : i64, tpu.core_type = #tpu.core_type<tc>, window_params = [{pipeline_mode = #tpu.pipeline_mode<synchronous>, transform_indices = @transform_0, window_bounds = array<i64: 288, 9>}, {pipeline_mode = #tpu.pipeline_mode<synchronous>, transform_indices = @transform_1, window_bounds = array<i64: 96, 128>}, {pipeline_mode = #tpu.pipeline_mode<synchronous>, transform_indices = @transform_2, window_bounds = array<i64: 96, 128>}, {transform_indices = @transform_3, window_bounds = array<i64: 9, 128>}, {transform_indices = @transform_4, window_bounds = array<i64: 32, 128>}]} {
    %c0 = arith.constant 0 : index
    %c0_0 = arith.constant 0 : index
    %0 = vector.load %arg4[%c0, %c0_0] : memref<9x128xf32, #tpu.memory_space<vmem>>, vector<9x128xf32>
    %c0_1 = arith.constant 0 : index
    %c0_2 = arith.constant 0 : index
    %1 = vector.load %arg1[%c0_1, %c0_2] : memref<288x9xf32, #tpu.memory_space<vmem>>, vector<288x9xf32>
    %cst = arith.constant dense<0.000000e+00> : vector<288x128xf32>
    %2 = tpu.matmul %1, %0, %cst {dimension_numbers = #tpu.dot_dimension_numbers<[1], [0], [0], [1], [0, 0, 1, 1], [], []>} : vector<288x9xf32>, vector<9x128xf32>, vector<288x128xf32> -> vector<288x128xf32>
    %3 = vector.extract_strided_slice %2 {offsets = [0, 0], sizes = [96, 128], strides = [1, 1]} : vector<288x128xf32> to vector<96x128xf32>
    %4 = vector.extract_strided_slice %2 {offsets = [0, 0], sizes = [96, 128], strides = [1, 1]} : vector<288x128xf32> to vector<96x128xf32>
    %5 = arith.mulf %3, %4 : vector<96x128xf32>
    %6 = vector.extract_strided_slice %2 {offsets = [96, 0], sizes = [96, 128], strides = [1, 1]} : vector<288x128xf32> to vector<96x128xf32>
    %7 = arith.mulf %6, %6 : vector<96x128xf32>
    %8 = arith.addf %5, %7 : vector<96x128xf32>
    %9 = vector.extract_strided_slice %2 {offsets = [192, 0], sizes = [96, 128], strides = [1, 1]} : vector<288x128xf32> to vector<96x128xf32>
    %10 = arith.mulf %9, %9 : vector<96x128xf32>
    %11 = arith.addf %8, %10 : vector<96x128xf32>
    %cst_3 = arith.constant 9.99999968E-21 : f32
    %cst_4 = arith.constant 2.500000e+03 : f32
    %12 = vector.broadcast %cst_3 : f32 to vector<96x128xf32>
    %13 = arith.maximumf %12, %11 : vector<96x128xf32>
    %14 = vector.broadcast %cst_4 : f32 to vector<96x128xf32>
    %15 = arith.minimumf %14, %13 : vector<96x128xf32>
    %16 = math.sqrt %15 : vector<96x128xf32>
    %17 = math.log %15 : vector<96x128xf32>
    %cst_5 = arith.constant 5.000000e-01 : f32
    %18 = vector.broadcast %cst_5 : f32 to vector<96x128xf32>
    %19 = arith.mulf %18, %17 : vector<96x128xf32>
    %c0_6 = arith.constant 0 : index
    %c0_7 = arith.constant 0 : index
    %20 = vector.load %arg2[%c0_6, %c0_7] : memref<96x128xf32, #tpu.memory_space<vmem>>, vector<96x128xf32>
    %21 = arith.mulf %20, %19 : vector<96x128xf32>
    %22 = arith.subf %21, %16 : vector<96x128xf32>
    %23 = math.exp %22 : vector<96x128xf32>
    %c0_8 = arith.constant 0 : index
    %c0_9 = arith.constant 0 : index
    %24 = vector.load %arg3[%c0_8, %c0_9] : memref<96x128xf32, #tpu.memory_space<vmem>>, vector<96x128xf32>
    %25 = arith.mulf %23, %24 : vector<96x128xf32>
    %26 = vector.extract_strided_slice %25 {offsets = [0, 0], sizes = [32, 128], strides = [1, 1]} : vector<96x128xf32> to vector<32x128xf32>
    %27 = vector.extract_strided_slice %25 {offsets = [32, 0], sizes = [32, 128], strides = [1, 1]} : vector<96x128xf32> to vector<32x128xf32>
    %28 = arith.addf %26, %27 : vector<32x128xf32>
    %29 = vector.extract_strided_slice %25 {offsets = [64, 0], sizes = [32, 128], strides = [1, 1]} : vector<96x128xf32> to vector<32x128xf32>
    %30 = arith.addf %28, %29 : vector<32x128xf32>
    %c0_10 = arith.constant 0 : index
    %c0_11 = arith.constant 0 : index
    %31 = vector.load %arg5[%c0_10, %c0_11] : memref<32x128xf32, #tpu.memory_space<vmem>>, vector<32x128xf32>
    tpu.vector_store %arg5[%c0_10, %c0_11], %30 {strides = array<i32>} : memref<32x128xf32, #tpu.memory_space<vmem>>, vector<32x128xf32>,
    return
  }
  func.func @transform_0(%arg0: i32) -> (i32, i32) {
    %c0_i32 = arith.constant 0 : i32
    %c0_i32_0 = arith.constant 0 : i32
    %c0_i32_1 = arith.constant 0 : i32
    return %c0_i32, %c0_i32_0 : i32, i32
  }
  func.func @transform_1(%arg0: i32) -> (i32, i32) {
    %c0_i32 = arith.constant 0 : i32
    %c0_i32_0 = arith.constant 0 : i32
    %c0_i32_1 = arith.constant 0 : i32
    return %c0_i32, %c0_i32_0 : i32, i32
  }
  func.func @transform_2(%arg0: i32) -> (i32, i32) {
    %c0_i32 = arith.constant 0 : i32
    %c0_i32_0 = arith.constant 0 : i32
    %c0_i32_1 = arith.constant 0 : i32
    return %c0_i32, %c0_i32_0 : i32, i32
  }
  func.func @transform_3(%arg0: i32) -> (i32, i32) {
    %c0_i32 = arith.constant 0 : i32
    %c0_i32_0 = arith.constant 0 : i32
    return %c0_i32, %arg0 : i32, i32
  }
  func.func @transform_4(%arg0: i32) -> (i32, i32) {
    %c0_i32 = arith.constant 0 : i32
    %c0_i32_0 = arith.constant 0 : i32
    return %c0_i32, %arg0 : i32, i32
  }
}

</mosaic_0001>

<bundles_post_ra>
// kernel: tpu_custom_call.1
= control target key start
LH: loop header
LB: loop body
LE: loop exit
PB: predicated region body
PF: predicated region fallthrough
CT: control target
= control target key end

     0   :  { %vm165_vm0 = vcmask 1040384   ;;  %vm971_vm1 = vmmov 1   ;;  %vm56_vm3 = vcmask 72704   ;;  %s1447_s0 = inlined_call_operand.vmem [shape: f32[288,9], index: 0, kind: input, shape index: {}]   ;;  %s1448_s1 = inlined_call_operand.vmem [shape: f32[96,128], index: 1, kind: input, shape index: {}]   ;;  %s1449_s2 = inlined_call_operand.vmem [shape: f32[96,128], index: 2, kind: input, shape index: {}]   ;;  %s1450_s3 = inlined_call_operand.vmem [shape: f32[9,128], index: 3, kind: input, shape index: {}]   ;;  %s1451_s4 = inlined_call_operand.hbm [shape: f32[32,128], index: 4, kind: output, shape index: {}]  }
   0x1   :  { %v18_v0 = vld [vmem:[%s1450_s3] sm:$0xff]  ;;  %v19_v1 = vld [vmem:[%s1450_s3 + $0x8] sm:$0x1]  ;;  %vm864_vm2 = vmpackc.low %vm165_vm0, %vm971_vm1 }
   0x2   :  { %v20_v2 = vld [vmem:[%s1447_s0] sm:$0xff]  ;;  %v863_v3 = vpack.c.bf16 %v19_v1, %v18_v0  ;;  %v38_v4 = vld [vmem:[%s1447_s0 + $0x90] sm:$0xff]  ;;  %v21_v5 = vld [vmem:[%s1447_s0 + $0x8] sm:$0xff] }
   0x3   :  { %809 = vmatprep.mubr.msk.f32.mxu0 %vm56_vm3, %v20_v2  ;;  %836 = vmatprep.mubr.msk.f32.mxu1 %vm56_vm3, %v38_v4  ;;  %v39_v6 = vld [vmem:[%s1447_s0 + $0x98] sm:$0xff]  ;;  %v22_v7 = vld [vmem:[%s1447_s0 + $0x10] sm:$0xff]  ;;  %v40_v8 = vld [vmem:[%s1447_s0 + $0xa0] sm:$0xff] }
   0x4   :  { %865 = vmatprep.subr.msk.bf16.mxu0 %vm864_vm2, %v863_v3  ;;  %869 = vmatprep.subr.msk.bf16.mxu1 %vm864_vm2, %v863_v3  ;;  %v23_v9 = vld [vmem:[%s1447_s0 + $0x18] sm:$0xff]  ;;  %v41_v10 = vld [vmem:[%s1447_s0 + $0xa8] sm:$0xff]  ;;  %v24_v11 = vld [vmem:[%s1447_s0 + $0x20] sm:$0xff] }
   0x5   :  { %868 = vmatpush3.bf16.msk.msra.mxu0 %vm864_vm2, %v863_v3  ;;  %870 = vmatpush3.bf16.msk.msra.mxu1 %vm864_vm2, %v863_v3  ;;  %v42_v12 = vld [vmem:[%s1447_s0 + $0xb0] sm:$0xff]  ;;  %v25_v13 = vld [vmem:[%s1447_s0 + $0x28] sm:$0xff]  ;;  %v43_v14 = vld [vmem:[%s1447_s0 + $0xb8] sm:$0xff] }
   0x6   :  { %v26_v15 = vld [vmem:[%s1447_s0 + $0x30] sm:$0xff]  ;;  %v44_v16 = vld [vmem:[%s1447_s0 + $0xc0] sm:$0xff] }
   0x8   :  { %810 = vmatmul.mubr.msk.f32.vlgmr.msra.gmra.mrb[0].mxu0 %vm56_vm3, %v21_v5  ;;  %837 = vmatmul.mubr.msk.f32.vlgmr.msra.gmra.mrb[0].mxu1 %vm56_vm3, %v39_v6 }
   0x9   :  { %812 = vmatprep.mubr.msk.f32.mxu0 %vm56_vm3, %v22_v7  ;;  %839 = vmatprep.mubr.msk.f32.mxu1 %vm56_vm3, %v40_v8 }
   0xc   :  { %813 = vmatmul.mubr.msk.f32.gmra.mrb[2].mxu0 %vm56_vm3, %v23_v9  ;;  %840 = vmatmul.mubr.msk.f32.gmra.mrb[2].mxu1 %vm56_vm3, %v41_v10 }
   0xd   :  { %815 = vmatprep.mubr.msk.f32.mxu0 %vm56_vm3, %v24_v11  ;;  %842 = vmatprep.mubr.msk.f32.mxu1 %vm56_vm3, %v42_v12 }
   0xe   :  { %9 = vsyncpa [#allocation3], 0  ;;  %v27_v17 = vld [vmem:[%s1447_s0 + $0x38] sm:$0xff]  ;;  %v45_v18 = vld [vmem:[%s1447_s0 + $0xc8] sm:$0xff]  ;;  %s972_s27 = smov [#allocation2]  }
   0xf   :  { %v28_v19 = vld [vmem:[%s1447_s0 + $0x40] sm:$0xff]  ;;  %v46_v20 = vld [vmem:[%s1447_s0 + $0xd0] sm:$0xff]  ;;  %v29_v21 = vld [vmem:[%s1447_s0 + $0x48] sm:$0xff]  ;;  %s719_s28 = sshll.u32 %s972_s27, 4  ;;  %s720_s28 = int_to_ptr.vmem [resolvable:$true] %s719_s28 }
  0x10   :  { %816 = vmatmul.mubr.msk.f32.gmra.mrb[4].mxu0 %vm56_vm3, %v25_v13  ;;  %843 = vmatmul.mubr.msk.f32.gmra.mrb[4].mxu1 %vm56_vm3, %v43_v14  ;;  %v47_v22 = vld [vmem:[%s1447_s0 + $0xd8] sm:$0xff]  ;;  %v30_v23 = vld [vmem:[%s1447_s0 + $0x50] sm:$0xff]  ;;  %v48_v24 = vld [vmem:[%s1447_s0 + $0xe0] sm:$0xff]  ;;  %s947_s29 = scalar_lea.vmem %s720_s28, 512  ;;  %p952_p1 = scmp.lt.s32.totalorder %s720_s28, %s720_s28 }
  0x11   :  { %818 = vmatprep.mubr.msk.f32.mxu0 %vm56_vm3, %v26_v15  ;;  %845 = vmatprep.mubr.msk.f32.mxu1 %vm56_vm3, %v44_v16  ;;  %v31_v25 = vld [vmem:[%s1447_s0 + $0x58] sm:$0xff]  ;;  %v49_v26 = vld [vmem:[%s1447_s0 + $0xe8] sm:$0xff]  ;;  %v32_v27 = vld [vmem:[%s1447_s0 + $0x60] sm:$0xff]  ;;  %p948_p0 = scmp.ne.s32.totalorder %s720_s28, %s947_s29  ;;  %p953_p2 = scmp.lt.s32.totalorder %s947_s29, %s947_s29 }
  0x12   :  { %v50_v28 = vld [vmem:[%s1447_s0 + $0xf0] sm:$0xff]  ;;  %v33_v29 = vld [vmem:[%s1447_s0 + $0x68] sm:$0xff]  ;;  %v51_v30 = vld [vmem:[%s1447_s0 + $0xf8] sm:$0xff] }
  0x13   :  { %v34_v31 = vld [vmem:[%s1447_s0 + $0x70] sm:$0xff]  ;;  %v52_v32 = vld [vmem:[%s1447_s0 + $0x100] sm:$0xff]  ;;  %v35_v33 = vld [vmem:[%s1447_s0 + $0x78] sm:$0xff]  ;;  %p954_p3 = por %p953_p2, %p952_p1 }
  0x14   :  { %819 = vmatmul.mubr.msk.f32.gmra.mrb[6].mxu0 %vm56_vm3, %v27_v17  ;;  %846 = vmatmul.mubr.msk.f32.gmra.mrb[6].mxu1 %vm56_vm3, %v45_v18  ;;  %v53_v34 = vld [vmem:[%s1447_s0 + $0x108] sm:$0xff]  ;;  %v36_v35 = vld [vmem:[%s1447_s0 + $0x80] sm:$0xff]  ;;  %v54_v36 = vld [vmem:[%s1447_s0 + $0x110] sm:$0xff] }
  0x15   :  { %821 = vmatprep.mubr.msk.f32.mxu0 %vm56_vm3, %v28_v19  ;;  %848 = vmatprep.mubr.msk.f32.mxu1 %vm56_vm3, %v46_v20  ;;  %v37_v37 = vld [vmem:[%s1447_s0 + $0x88] sm:$0xff]  ;;  %v55_v38 = vld [vmem:[%s1447_s0 + $0x118] sm:$0xff]  ;;  %p955_p4 = pnand %p954_p3, %p948_p0 }
  0x18   :  { %822 = vmatmul.mubr.msk.f32.gmra.mrb[8].mxu0 %vm56_vm3, %v29_v21  ;;  %849 = vmatmul.mubr.msk.f32.gmra.mrb[8].mxu1 %vm56_vm3, %v47_v22 }
  0x19   :  { %824 = vmatprep.mubr.msk.f32.mxu0 %vm56_vm3, %v30_v23  ;;  %851 = vmatprep.mubr.msk.f32.mxu1 %vm56_vm3, %v48_v24 }
  0x1c   :  { %825 = vmatmul.mubr.msk.f32.gmra.mrb[10].mxu0 %vm56_vm3, %v31_v25  ;;  %852 = vmatmul.mubr.msk.f32.gmra.mrb[10].mxu1 %vm56_vm3, %v49_v26 }
  0x1d   :  { %827 = vmatprep.mubr.msk.f32.mxu0 %vm56_vm3, %v32_v27  ;;  %854 = vmatprep.mubr.msk.f32.mxu1 %vm56_vm3, %v50_v28 }
  0x20   :  { %828 = vmatmul.mubr.msk.f32.gmra.mrb[12].mxu0 %vm56_vm3, %v33_v29  ;;  %855 = vmatmul.mubr.msk.f32.gmra.mrb[12].mxu1 %vm56_vm3, %v51_v30 }
  0x21   :  { %830 = vmatprep.mubr.msk.f32.mxu0 %vm56_vm3, %v34_v31  ;;  %857 = vmatprep.mubr.msk.f32.mxu1 %vm56_vm3, %v52_v32 }
  0x24   :  { %831 = vmatmul.mubr.msk.f32.gmra.mrb[14].mxu0 %vm56_vm3, %v35_v33  ;;  %858 = vmatmul.mubr.msk.f32.gmra.mrb[14].mxu1 %vm56_vm3, %v53_v34 }
  0x25   :  { %833 = vmatprep.mubr.msk.f32.mxu0 %vm56_vm3, %v36_v35  ;;  %860 = vmatprep.mubr.msk.f32.mxu1 %vm56_vm3, %v54_v36 }
  0x28   :  { %834 = vmatmul.mubr.msk.f32.gmra.mrb[16].mxu0 %vm56_vm3, %v37_v37  ;;  %861 = vmatmul.mubr.msk.f32.gmra.mrb[16].mxu1 %vm56_vm3, %v55_v38 }
  0xdb   :  { %v811_v39 = vpop.f32.mrb[0].mxu0  ;;  %v838_v40 = vpop.f32.mrb[0].mxu1 }
  0xdc   :  { %v235_v41 = vpop.f32.mrb[1].mxu0  ;;  %v325_v42 = vpop.f32.mrb[1].mxu1  ;;  %v433_v53 = vmul.f32 %v838_v40, %v838_v40  ;;  %v415_v19 = vmul.f32 %v811_v39, %v811_v39 }
  0xdd   :  { %v432_v57 = vmul.f32 %v325_v42, %v325_v42  ;;  %v414_v24 = vmul.f32 %v235_v41, %v235_v41 }
  0xdf   :  { %v814_v43 = vpop.f32.mrb[2].mxu0  ;;  %v841_v44 = vpop.f32.mrb[2].mxu1 }
  0xe0   :  { %v245_v45 = vpop.f32.mrb[3].mxu0  ;;  %v335_v46 = vpop.f32.mrb[3].mxu1  ;;  %v435_v63 = vmul.f32 %v841_v44, %v841_v44  ;;  %v417_v30 = vmul.f32 %v814_v43, %v814_v43 }
  0xe1   :  { %v434_v3 = vmul.f32 %v335_v46, %v335_v46  ;;  %v416_v44 = vmul.f32 %v245_v45, %v245_v45 }
  0xe3   :  { %v1150_v47 = vpop.f32.mrb[4].mxu0  ;;  %v844_v48 = vpop.f32.mrb[4].mxu1 }
  0xe4   :  { %v1152_v49 = vpop.f32.mrb[5].mxu0  ;;  %v345_v50 = vpop.f32.mrb[5].mxu1  ;;  %v437_v9 = vmul.f32 %v844_v48, %v844_v48 }
  0xe5   :  { %v436_v13 = vmul.f32 %v345_v50, %v345_v50 }
  0xe7   :  { %v820_v51 = vpop.f32.mrb[6].mxu0  ;;  %v847_v52 = vpop.f32.mrb[6].mxu1 }
  0xe8   :  { %v421_v54 = vmul.f32 %v820_v51, %v820_v51  ;;  %v265_v55 = vpop.f32.mrb[7].mxu0  ;;  %v355_v56 = vpop.f32.mrb[7].mxu1  ;;  %v451_v27 = vmul.f32 %v847_v52, %v847_v52 }
  0xe9   :  { %v420_v58 = vmul.f32 %v265_v55, %v265_v55  ;;  %v450_v31 = vmul.f32 %v355_v56, %v355_v56 }
  0xea   :  { %v445_v59 = vadd.f32 %v433_v53, %v421_v54 }
  0xeb   :  { %v444_v60 = vadd.f32 %v432_v57, %v420_v58  ;;  %v823_v61 = vpop.f32.mrb[8].mxu0  ;;  %v1154_v62 = vpop.f32.mrb[8].mxu1 }
  0xec   :  { %v423_v0 = vmul.f32 %v823_v61, %v823_v61  ;;  %v275_v1 = vpop.f32.mrb[9].mxu0  ;;  %v365_v2 = vpop.f32.mrb[9].mxu1 }
  0xed   :  { %v422_v4 = vmul.f32 %v275_v1, %v275_v1 }
  0xee   :  { %v447_v5 = vadd.f32 %v435_v63, %v423_v0  ;;  %v453_v63 = vmul.f32 %v1154_v62, %v1154_v62  ;;  %v452_v0 = vmul.f32 %v365_v2, %v365_v2 }
  0xef   :  { %v446_v6 = vadd.f32 %v434_v3, %v422_v4  ;;  %v826_v7 = vpop.f32.mrb[10].mxu0  ;;  %v1156_v8 = vpop.f32.mrb[10].mxu1  ;;  %v419_v4 = vmul.f32 %v1150_v47, %v1150_v47 }
  0xf0   :  { %v425_v10 = vmul.f32 %v826_v7, %v826_v7  ;;  %v285_v11 = vpop.f32.mrb[11].mxu0  ;;  %v1158_v12 = vpop.f32.mrb[11].mxu1 }
  0xf1   :  { %v424_v14 = vmul.f32 %v285_v11, %v285_v11 }
  0xf2   :  { %v1160_v15 = vadd.f32 %v437_v9, %v425_v10 }
  0xf3   :  { %v1162_v16 = vadd.f32 %v436_v13, %v424_v14  ;;  %v829_v17 = vpop.f32.mrb[12].mxu0  ;;  %v856_v18 = vpop.f32.mrb[12].mxu1 }
  0xf4   :  { %v427_v20 = vmul.f32 %v829_v17, %v829_v17  ;;  %v457_v21 = vmul.f32 %v856_v18, %v856_v18  ;;  %v295_v22 = vpop.f32.mrb[13].mxu0  ;;  %v385_v23 = vpop.f32.mrb[13].mxu1 }
  0xf5   :  { %v426_v25 = vmul.f32 %v295_v22, %v295_v22  ;;  %v456_v26 = vmul.f32 %v385_v23, %v385_v23  ;;  %v454_v23 = vmul.f32 %v1158_v12, %v1158_v12 }
  0xf6   :  { %v439_v28 = vadd.f32 %v427_v20, %v415_v19  ;;  %v469_v29 = vadd.f32 %v457_v21, %v445_v59  ;;  %v418_v20 = vmul.f32 %v1152_v49, %v1152_v49  ;;  %v455_v21 = vmul.f32 %v1156_v8, %v1156_v8 }
  0xf7   :  { %v438_v32 = vadd.f32 %v426_v25, %v414_v24  ;;  %v468_v33 = vadd.f32 %v456_v26, %v444_v60  ;;  %v832_v34 = vpop.f32.mrb[14].mxu0  ;;  %v859_v35 = vpop.f32.mrb[14].mxu1 }
  0xf8   :  { %v463_v36 = vadd.f32 %v451_v27, %v439_v28  ;;  %v481_v37 = vmax.f32 %v469_v29, 1e-20  ;;  %v429_v38 = vmul.f32 %v832_v34, %v832_v34  ;;  %v459_v39 = vmul.f32 %v859_v35, %v859_v35  ;;  %v305_v40 = vpop.f32.mrb[15].mxu0  ;;  %v395_v42 = vpop.f32.mrb[15].mxu1  ;;  %v625_v35 = vld [vmem:[%s1448_s1 + $0x38] sm:$0xff] }
  0xf9   :  { %v462_v46 = vadd.f32 %v450_v31, %v438_v32  ;;  %v428_v41 = vmul.f32 %v305_v40, %v305_v40  ;;  %v458_v48 = vmul.f32 %v395_v42, %v395_v42  ;;  %v480_v54 = vmax.f32 %v468_v33, 1e-20 }
  0xfa   :  { %v475_v50 = vmax.f32 %v463_v36, 1e-20  ;;  %v1164_v51 = vmin.f32 %v481_v37, 2500.0  ;;  %v441_v52 = vadd.f32 %v429_v38, %v417_v30  ;;  %v471_v43 = vadd.f32 %v459_v39, %v447_v5 }
  0xfb   :  { %v474_v53 = vmax.f32 %v462_v46, 1e-20  ;;  %v440_v55 = vadd.f32 %v428_v41, %v416_v44  ;;  %v470_v56 = vadd.f32 %v458_v48, %v446_v6  ;;  %v835_v57 = vpop.f32.mrb[16].mxu0  ;;  %v862_v58 = vpop.f32.mrb[16].mxu1  ;;  %v1177_v1 = vmin.f32 %v480_v54, 2500.0 }
  0xfc   :  { %v1166_v59 = vmin.f32 %v475_v50, 2500.0  ;;  %875 = vrsqrt.f32 %v1164_v51  ;;  %v315_v60 = vpop.f32.mrb[17].mxu0  ;;  %v1169_v45 = vpop.f32.mrb[17].mxu1  ;;  %v465_v3 = vadd.f32 %v453_v63, %v441_v52  ;;  %v483_v5 = vmax.f32 %v471_v43, 1e-20 }
  0xfd   :  { %877 = vlog2.f32 %v1164_v51  ;;  %v1172_v61 = vmin.f32 %v474_v53, 2500.0  ;;  %v464_v6 = vadd.f32 %v452_v0, %v440_v55  ;;  %v431_v9 = vmul.f32 %v835_v57, %v835_v57 }
  0xfe   :  { %879 = vrsqrt.f32 %v1166_v59  ;;  %v477_v7 = vmax.f32 %v465_v3, 1e-20  ;;  %v461_v62 = vmul.f32 %v862_v58, %v862_v58  ;;  %v1185_v2 = vmin.f32 %v483_v5, 2500.0 }
  0xff   :  { %881 = vlog2.f32 %v1166_v59  ;;  %v476_v10 = vmax.f32 %v464_v6, 1e-20  ;;  %v443_v13 = vadd.f32 %v431_v9, %v419_v4  ;;  %v482_v14 = vmax.f32 %v470_v56, 1e-20 }
 0x100   :  { %883 = vrsqrt.f32 %v1172_v61  ;;  %v1188_v11 = vmin.f32 %v477_v7, 2500.0  ;;  %v1191_v47 = vadd.f32 %v461_v62, %v1160_v15  ;;  %vm507_vm4 = vcmp.eq.f32.partialorder %v1166_v59, inf }
 0x101   :  { %885 = vlog2.f32 %v1172_v61  ;;  %v1196_v19 = vmin.f32 %v476_v10, 2500.0  ;;  %v1207_v25 = vmin.f32 %v482_v14, 2500.0  ;;  %vm549_vm5 = vcmp.eq.f32.partialorder %v1164_v51, inf }
 0x102   :  { %887 = vlog2.f32 %v1177_v1  ;;  %vm551_vm6 = vcmp.eq.f32.partialorder %v1164_v51, 0.0  ;;  %v552_v49 = vand.u32 2147483648, %v1164_v51  ;;  %vm509_vm7 = vcmp.eq.f32.partialorder %v1166_v59, 0.0 }
 0x103   :  { %889 = vrsqrt.f32 %v1177_v1  ;;  %v510_v12 = vand.u32 2147483648, %v1166_v59  ;;  %vm500_vm8 = vcmp.eq.f32.partialorder %v1172_v61, inf  ;;  %vm502_vm9 = vcmp.eq.f32.partialorder %v1172_v61, 0.0 }
 0x104   :  { %891 = vrsqrt.f32 %v1185_v2  ;;  %v503_v29 = vand.u32 2147483648, %v1172_v61  ;;  %v545_v30 = vand.u32 2147483648, %v1177_v1  ;;  %v430_v31 = vmul.f32 %v315_v60, %v315_v60 }
 0x105   :  { %893 = vrsqrt.f32 %v1188_v11  ;;  %vm542_vm10 = vcmp.eq.f32.partialorder %v1177_v1, inf  ;;  %v467_v36 = vadd.f32 %v455_v21, %v443_v13  ;;  %v524_v39 = vand.u32 2147483648, %v1188_v11 }
 0x106   :  { %v876_v17 = vpop.eup %875  ;;  %895 = vlog2.f32 %v1188_v11  ;;  %vm563_vm11 = vcmp.eq.f32.partialorder %v1185_v2, inf  ;;  %v566_v40 = vand.u32 2147483648, %v1185_v2  ;;  %v559_v42 = vand.u32 2147483648, %v1207_v25 }
 0x107   :  { %v878_v18 = vpop.eup %877  ;;  %897 = vlog2.f32 %v1185_v2  ;;  %v548_v24 = vmul.f32 %v876_v17, %v1164_v51  ;;  %vm521_vm12 = vcmp.eq.f32.partialorder %v1188_v11, inf  ;;  %v479_v41 = vmax.f32 %v467_v36, 1e-20 }
 0x108   :  { %v597_v22 = vmul.f32 0.6931472, %v878_v18  ;;  %v880_v15 = vpop.eup %879  ;;  %899 = vrsqrt.f32 %v1196_v19  ;;  %v485_v48 = vmax.f32 %v1191_v47, 1e-20  ;;  %vm544_vm13 = vcmp.eq.f32.partialorder %v1177_v1, 0.0  ;;  %v624_v47 = vld [vmem:[%s1448_s1 + $0x30] sm:$0xff] }
 0x109   :  { %v882_v26 = vpop.eup %881  ;;  %901 = vlog2.f32 %v1196_v19  ;;  %v506_v33 = vmul.f32 %v880_v15, %v1166_v59  ;;  %v550_v34 = vsel %vm549_vm5, %v1164_v51, %v548_v24  ;;  %vm514_vm14 = vcmp.eq.f32.partialorder %v1196_v19, inf }
 0x10a   :  { %v884_v8 = vpop.eup %883  ;;  %v613_v28 = vmul.f32 0.5, %v597_v22  ;;  %903 = vrsqrt.f32 %v1207_v25  ;;  %v585_v52 = vmul.f32 0.6931472, %v882_v26  ;;  %v1239_v43 = vsel %vm551_vm6, %v552_v49, %v550_v34 }
 0x10b   :  { %v886_v27 = vpop.eup %885  ;;  %v499_v38 = vmul.f32 %v884_v8, %v1172_v61  ;;  %905 = vlog2.f32 %v1207_v25  ;;  %v442_v54 = vadd.f32 %v430_v31, %v418_v20  ;;  %v508_v56 = vsel %vm507_vm4, %v1166_v59, %v506_v33  ;;  %v621_v8 = vld [vmem:[%s1448_s1 + $0x18] sm:$0xff] }
 0x10c   :  { %v888_v32 = vpop.eup %887  ;;  %v1241_v53 = vmul.f32 %v625_v35, %v613_v28  ;;  %v583_v57 = vmul.f32 0.6931472, %v886_v27  ;;  %v517_v58 = vand.u32 2147483648, %v1196_v19  ;;  %v1249_v60 = vmin.f32 %v479_v41, 2500.0  ;;  %v619_v35 = vld [vmem:[%s1448_s1 + $0x8] sm:$0xff] }
 0x10d   :  { %v890_v37 = vpop.eup %889  ;;  %v595_v46 = vmul.f32 0.6931472, %v888_v32  ;;  %v501_v63 = vsel %vm500_vm8, %v1172_v61, %v499_v38  ;;  %vm523_vm15 = vcmp.eq.f32.partialorder %v1188_v11, 0.0  ;;  %vm565_vm0 = vcmp.eq.f32.partialorder %v1185_v2, 0.0  ;;  %v627_v41 = vld [vmem:[%s1448_s1 + $0x48] sm:$0xff] }
 0x10e   :  { %v892_v44 = vpop.eup %891  ;;  %v541_v0 = vmul.f32 %v890_v37, %v1177_v1  ;;  %v466_v4 = vadd.f32 %v454_v23, %v442_v54  ;;  %907 = vrsqrt.f32 %v1249_v60  ;;  %v1259_v9 = vmin.f32 %v485_v48, 2500.0 }
 0x10f   :  { %v894_v50 = vpop.eup %893  ;;  %v612_v6 = vmul.f32 0.5, %v595_v46  ;;  %v562_v7 = vmul.f32 %v892_v44, %v1185_v2  ;;  %v1263_v62 = vsel %vm509_vm7, %v510_v12, %v508_v56  ;;  %v607_v10 = vmul.f32 0.5, %v585_v52 }
 0x110   :  { %v896_v55 = vpop.eup %895  ;;  %v649_v13 = vsub.f32 %v1241_v53, %v1239_v43  ;;  %v520_v14 = vmul.f32 %v894_v50, %v1188_v11  ;;  %vm516_vm1 = vcmp.eq.f32.partialorder %v1196_v19, 0.0  ;;  %v1274_v18 = vsel %vm502_vm9, %v503_v29, %v501_v63 }
 0x111   :  { %v898_v51 = vpop.eup %897  ;;  %v589_v3 = vmul.f32 0.6931472, %v896_v55  ;;  %vm556_vm2 = vcmp.eq.f32.partialorder %v1207_v25, inf  ;;  %v460_v21 = vmul.f32 %v1169_v45, %v1169_v45  ;;  %v543_v22 = vsel %vm542_vm10, %v1177_v1, %v541_v0  ;;  %v620_v45 = vld [vmem:[%s1448_s1 + $0x10] sm:$0xff] }
 0x112   :  { %v900_v5 = vpop.eup %899  ;;  %v601_v59 = vmul.f32 0.6931472, %v898_v51  ;;  %909 = vlog2.f32 %v1249_v60  ;;  %v606_v61 = vmul.f32 0.5, %v583_v57  ;;  %v1284_v26 = vmul.f32 %v624_v47, %v612_v6 }
 0x113   :  { %v902_v17 = vpop.eup %901  ;;  %v513_v20 = vmul.f32 %v900_v5, %v1196_v19  ;;  %v609_v15 = vmul.f32 0.5, %v589_v3  ;;  %v564_v49 = vsel %vm563_vm11, %v1185_v2, %v562_v7  ;;  %911 = vrsqrt.f32 %v1259_v9  ;;  %v626_v7 = vld [vmem:[%s1448_s1 + $0x40] sm:$0xff] }
 0x114   :  { %v587_v23 = vmul.f32 0.6931472, %v902_v17  ;;  %v904_v24 = vpop.eup %903  ;;  %v522_v12 = vsel %vm521_vm12, %v1188_v11, %v520_v14  ;;  %vm558_vm3 = vcmp.eq.f32.partialorder %v1207_v25, 0.0  ;;  %913 = vlog2.f32 %v1259_v9 }
 0x115   :  { %v478_v28 = vmax.f32 %v466_v4, 1e-20  ;;  %v906_v29 = vpop.eup %905  ;;  %v546_v31 = vsel %vm544_vm13, %v545_v30, %v543_v22  ;;  %v615_v32 = vmul.f32 0.5, %v601_v59  ;;  %v515_v33 = vsel %vm514_vm14, %v1196_v19, %v513_v20  ;;  %v629_v22 = vld [vmem:[%s1448_s1 + $0x58] sm:$0xff] }
 0x116   :  { %v608_v27 = vmul.f32 0.5, %v587_v23  ;;  %v472_v34 = vadd.f32 %v460_v21, %v1162_v16  ;;  %v555_v36 = vmul.f32 %v904_v24, %v1207_v25  ;;  %v633_v44 = vmul.f32 %v621_v8, %v609_v15 }
 0x117   :  { %v1313_v37 = vmin.f32 %v478_v28, 2500.0  ;;  %v648_v1 = vsub.f32 %v1284_v26, %v546_v31  ;;  %v525_v30 = vsel %vm523_vm15, %v524_v39, %v522_v12  ;;  %v567_v16 = vsel %vm565_vm0, %v566_v40, %v564_v49  ;;  %v618_v39 = vld [vmem:[%s1448_s1] sm:$0xff] }
 0x118   :  { %v632_v38 = vmul.f32 %v620_v45, %v608_v27  ;;  %v484_v46 = vmax.f32 %v472_v34, 1e-20  ;;  %v599_v48 = vmul.f32 0.6931472, %v906_v29  ;;  %vm535_vm4 = vcmp.eq.f32.partialorder %v1249_v60, inf  ;;  %v908_v52 = vpop.eup %907 }
 0x119   :  { %915 = vrsqrt.f32 %v1313_v37  ;;  %v631_v50 = vmul.f32 %v619_v35, %v607_v10  ;;  %v518_v11 = vsel %vm516_vm1, %v517_v58, %v515_v33  ;;  %vm537_vm5 = vcmp.eq.f32.partialorder %v1249_v60, 0.0 }
 0x11a   :  { %917 = vlog2.f32 %v1313_v37  ;;  %v1335_v2 = vmin.f32 %v484_v46, 2500.0  ;;  %v557_v40 = vsel %vm556_vm2, %v1207_v25, %v555_v36  ;;  %v639_v54 = vmul.f32 %v627_v41, %v615_v32 }
 0x11b   :  { %v644_v55 = vsub.f32 %v632_v38, %v518_v11  ;;  %v645_v56 = vsub.f32 %v633_v44, %v525_v30  ;;  %v534_v19 = vmul.f32 %v908_v52, %v1249_v60  ;;  %v538_v57 = vand.u32 2147483648, %v1249_v60 }
 0x11c   :  { %vm577_vm6 = vcmp.eq.f32.partialorder %v1259_v9, inf  ;;  %919 = vrsqrt.f32 %v1335_v2  ;;  %v910_v58 = vpop.eup %909  ;;  %v614_v51 = vmul.f32 0.5, %v599_v48  ;;  %v630_v63 = vmul.f32 %v618_v39, %v606_v61  ;;  %v680_v39 = vld [vmem:[%s1449_s2 + $0x10] sm:$0xff] }
 0x11d   :  { %921 = vlog2.f32 %v1335_v2  ;;  %v643_v0 = vsub.f32 %v631_v50, %v1263_v62  ;;  %v912_v3 = vpop.eup %911  ;;  %v560_v4 = vsel %vm558_vm3, %v559_v42, %v557_v40  ;;  %v593_v5 = vmul.f32 0.6931472, %v910_v58  ;;  %v623_v62 = vld [vmem:[%s1448_s1 + $0x28] sm:$0xff] }
 0x11e   :  { %vm579_vm7 = vcmp.eq.f32.partialorder %v1259_v9, 0.0  ;;  %v580_v6 = vand.u32 2147483648, %v1259_v9  ;;  %v914_v10 = vpop.eup %913  ;;  %v576_v47 = vmul.f32 %v912_v3, %v1259_v9  ;;  %v651_v14 = vsub.f32 %v639_v54, %v567_v16  ;;  %v628_v16 = vld [vmem:[%s1448_s1 + $0x50] sm:$0xff] }
 0x11f   :  { %v658_v17 = vmul.f32 1.442695, %v644_v55  ;;  %v660_v25 = vmul.f32 1.442695, %v645_v56  ;;  %v536_v42 = vsel %vm535_vm4, %v1249_v60, %v534_v19  ;;  %v611_v59 = vmul.f32 0.5, %v593_v5  ;;  %v622_v60 = vld [vmem:[%s1448_s1 + $0x20] sm:$0xff] }
 0x120   :  { %v605_v20 = vmul.f32 0.6931472, %v914_v10  ;;  %v666_v21 = vmul.f32 1.442695, %v648_v1  ;;  %v638_v15 = vmul.f32 %v626_v7, %v614_v51  ;;  %v642_v23 = vsub.f32 %v630_v63, %v1274_v18  ;;  %v681_v55 = vld [vmem:[%s1449_s2 + $0x18] sm:$0xff]  ;;  %v684_v19 = vld [vmem:[%s1449_s2 + $0x30] sm:$0xff] }
 0x121   :  { %v656_v24 = vmul.f32 1.442695, %v643_v0  ;;  %v668_v61 = vmul.f32 1.442695, %v649_v13  ;;  %v578_v26 = vsel %vm577_vm6, %v1259_v9, %v576_v47  ;;  %v635_v45 = vmul.f32 %v623_v62, %v611_v59  ;;  %v685_v63 = vld [vmem:[%s1449_s2 + $0x38] sm:$0xff]  ;;  %v679_v47 = vld [vmem:[%s1449_s2 + $0x8] sm:$0xff] }
 0x122   :  { %v617_v49 = vmul.f32 0.5, %v605_v20  ;;  %923 = vpow2.f32 %v658_v17  ;;  %v539_v12 = vsel %vm537_vm5, %v538_v57, %v536_v42  ;;  %vm528_vm8 = vcmp.eq.f32.partialorder %v1313_v37, inf  ;;  %v683_v62 = vld [vmem:[%s1449_s2 + $0x28] sm:$0xff]  ;;  %v689_v20 = vld [vmem:[%s1449_s2 + $0x58] sm:$0xff] }
 0x123   :  { %v916_v8 = vpop.eup %915  ;;  %925 = vpow2.f32 %v660_v25  ;;  %v672_v18 = vmul.f32 1.442695, %v651_v14  ;;  %v647_v53 = vsub.f32 %v635_v45, %v539_v12  ;;  %v581_v13 = vsel %vm579_vm7, %v580_v6, %v578_v26  ;;  %v687_v59 = vld [vmem:[%s1449_s2 + $0x48] sm:$0xff]  ;;  %v678_v45 = vld [vmem:[%s1449_s2] sm:$0xff] }
 0x124   :  { %v918_v27 = vpop.eup %917  ;;  %v527_v28 = vmul.f32 %v916_v8, %v1313_v37  ;;  %v641_v43 = vmul.f32 %v629_v22, %v617_v49  ;;  %927 = vpow2.f32 %v666_v21  ;;  %v650_v31 = vsub.f32 %v638_v15, %v560_v4  ;;  %v682_v8 = vld [vmem:[%s1449_s2 + $0x20] sm:$0xff] }
 0x125   :  { %v591_v29 = vmul.f32 0.6931472, %v918_v27  ;;  %929 = vpow2.f32 %v668_v61  ;;  %vm530_vm9 = vcmp.eq.f32.partialorder %v1313_v37, 0.0  ;;  %v664_v34 = vmul.f32 1.442695, %v647_v53  ;;  %v688_v53 = vld [vmem:[%s1449_s2 + $0x50] sm:$0xff] }
 0x126   :  { %v920_v32 = vpop.eup %919  ;;  %v653_v33 = vsub.f32 %v641_v43, %v581_v13  ;;  %931 = vpow2.f32 %v656_v24  ;;  %v529_v36 = vsel %vm528_vm8, %v1313_v37, %v527_v28  ;;  %v531_v44 = vand.u32 2147483648, %v1313_v37  ;;  %v686_v43 = vld [vmem:[%s1449_s2 + $0x40] sm:$0xff] }
 0x127   :  { %v922_v35 = vpop.eup %921  ;;  %v610_v9 = vmul.f32 0.5, %v591_v29  ;;  %v569_v38 = vmul.f32 %v920_v32, %v1335_v2  ;;  %933 = vpow2.f32 %v672_v18  ;;  %vm570_vm10 = vcmp.eq.f32.partialorder %v1335_v2, inf }
 0x128   :  { %v603_v1 = vmul.f32 0.6931472, %v922_v35  ;;  %935 = vpow2.f32 %v664_v34  ;;  %v676_v30 = vmul.f32 1.442695, %v653_v33  ;;  %v654_v41 = vmul.f32 1.442695, %v642_v23 }
 0x129   :  { %v634_v46 = vmul.f32 %v622_v60, %v610_v9  ;;  %v670_v48 = vmul.f32 1.442695, %v650_v31  ;;  %v532_v50 = vsel %vm530_vm9, %v531_v44, %v529_v36  ;;  %v571_v52 = vsel %vm570_vm10, %v1335_v2, %v569_v38 }
 0x12a   :  { %v616_v11 = vmul.f32 0.5, %v603_v1  ;;  %937 = vpow2.f32 %v676_v30  ;;  %v573_v40 = vand.u32 2147483648, %v1335_v2  ;;  %vm572_vm11 = vcmp.eq.f32.partialorder %v1335_v2, 0.0 }
 0x12b   :  { %v646_v54 = vsub.f32 %v634_v46, %v532_v50  ;;  %939 = vpow2.f32 %v654_v41 }
 0x12c   :  { %v924_v56 = vpop.eup %923  ;;  %v640_v37 = vmul.f32 %v628_v16, %v616_v11  ;;  %v574_v58 = vsel %vm572_vm11, %v573_v40, %v571_v52  ;;  %941 = vpow2.f32 %v670_v48 }
 0x12d   :  { %v926_v57 = vpop.eup %925  ;;  %v662_v51 = vmul.f32 1.442695, %v646_v54  ;;  %v692_v0 = vmul.f32 %v924_v56, %v680_v39 }
 0x12e   :  { %v928_v3 = vpop.eup %927  ;;  %v652_v4 = vsub.f32 %v640_v37, %v574_v58  ;;  %v693_v5 = vmul.f32 %v926_v57, %v681_v55 }
 0x12f   :  { %v930_v6 = vpop.eup %929  ;;  %943 = vpow2.f32 %v662_v51  ;;  %v696_v2 = vmul.f32 %v928_v3, %v684_v19 }
 0x130   :  { %v932_v7 = vpop.eup %931  ;;  %v674_v10 = vmul.f32 1.442695, %v652_v4  ;;  %v697_v14 = vmul.f32 %v930_v6, %v685_v63 }
 0x131   :  { %v934_v17 = vpop.eup %933  ;;  %v704_v25 = vadd.f32 %v696_v2, %v692_v0  ;;  %v691_v22 = vmul.f32 %v932_v7, %v679_v47 }
 0x132   :  { %v936_v42 = vpop.eup %935  ;;  %945 = vpow2.f32 %v674_v10  ;;  %v705_v21 = vadd.f32 %v697_v14, %v693_v5  ;;  %v699_v24 = vmul.f32 %v934_v17, %v687_v59 }
 0x133   :  { %v695_v15 = vmul.f32 %v936_v42, %v683_v62 }
 0x134   :  { %v938_v23 = vpop.eup %937 }
 0x135   :  { %v701_v61 = vmul.f32 %v938_v23, %v689_v20  ;;  %v703_v26 = vadd.f32 %v695_v15, %v691_v22  ;;  %v940_v49 = vpop.eup %939 }
 0x136   :  { %v942_v27 = vpop.eup %941  ;;  %v690_v13 = vmul.f32 %v940_v49, %v678_v45 }
 0x137   :  { %v707_v12 = vadd.f32 %v703_v26, %v699_v24  ;;  %v709_v18 = vadd.f32 %v705_v21, %v701_v61  ;;  %v698_v32 = vmul.f32 %v942_v27, %v686_v43 }
 0x139   :  { %v944_v28 = vpop.eup %943  ;;  %711 = vst [vmem:[#allocation2 + $0x8] sm:$0xff] %v707_v12  ;;  %713 = vst [vmem:[#allocation2 + $0x18] sm:$0xff] %v709_v18 }
 0x13a   :  { %v694_v29 = vmul.f32 %v944_v28, %v682_v8 }
 0x13c   :  { %v946_v31 = vpop.eup %945  ;;  %v702_v60 = vadd.f32 %v694_v29, %v690_v13 }
 0x13d   :  { %v700_v33 = vmul.f32 %v946_v31, %v688_v53 }
 0x13e   :  { %v706_v34 = vadd.f32 %v702_v60, %v698_v32 }
 0x13f   :  { %v708_v35 = vadd.f32 %v704_v25, %v700_v33 }
 0x140   :  { %710 = vst [vmem:[#allocation2] sm:$0xff] %v706_v34 }
 0x141   :  { %712 = vst [vmem:[#allocation2 + $0x10] sm:$0xff] %v708_v35 }
 0x142   :  { %958 = shalt.err (!%p955_p4)
}
 0x143   :  { %s959_s5 = scalar_lea.hbm %s1451_s4, 512 }
 0x144   :  { %p960_p5 = scmp.ne.s32.totalorder %s1451_s4, %s959_s5  ;;  %p963_p6 = scmp.lt.u32.totalorder %s959_s5, %s1451_s4 }
 0x146   :  { %p965_p7 = pnand %p963_p6, %p960_p5 }
 0x148   :  { %968 = shalt.err (!%p965_p7)
}
 0x149   :  { %s973_s1 = smov 128   ;;  %s974_s0 = smov 8  }
 0x14a   :  { %725 = dma.vmem_to_hbm [thread:$0]  %s720_s28, 512, %s1451_s4, [#allocation3], %s973_s1, %s973_s1, %s974_s0  }
 0x14b   :  { %969 = dma.done.wait [#allocation3], 512  }
 0x14c   :  { %970 = vsyncadd [#allocation3], 4294966784 }
 0x14d   :  { %729 = vsyncpa [#allocation3], 1 }

</bundles_post_ra>
